<compile_context>
chip_gen: v7x
topology: tpu7x:2x2x1
jax: 0.10.0
libtpu: 0.0.40
codegen_flags: <defaults>
</compile_context>

<pallas_src>
import functools
import math

import jax
import jax.numpy as jnp
from jax import lax
from jax.experimental import pallas as pl
from jax.experimental.pallas import tpu as pltpu


def _round_up(x: int, m: int) -> int:
    return ((x + m - 1) // m) * m


def _prenorm_residual_kernel(x_ref, gamma_ref, beta_ref,
                             w1_ref, b1_ref, w2_ref, b2_ref,
                             o_ref, *, eps: float):
    # x block: (TR, D); gamma/beta/b2: (1, D); w1: (D, H); b1: (1, H); w2: (H, D)
    x = x_ref[...].astype(jnp.float32)

    # --- LayerNorm over the last dim (torch.nn.LayerNorm semantics) ---
    mean = jnp.mean(x, axis=-1, keepdims=True)
    xc = x - mean
    var = jnp.mean(xc * xc, axis=-1, keepdims=True)
    inv = lax.rsqrt(var + eps)                      # EUP rsqrt — free slot
    xn = xc * inv * gamma_ref[...].astype(jnp.float32) \
         + beta_ref[...].astype(jnp.float32)

    # --- fn: Linear -> GELU -> Linear (MLP-Mixer FeedForward) ---
    h = jnp.dot(xn, w1_ref[...],
                preferred_element_type=jnp.float32,
                precision=lax.Precision.HIGHEST) + b1_ref[...].astype(jnp.float32)
    h = jax.nn.gelu(h, approximate=True)            # tanh GELU -> EUP slot
    y = jnp.dot(h, w2_ref[...],
                preferred_element_type=jnp.float32,
                precision=lax.Precision.HIGHEST) + b2_ref[...].astype(jnp.float32)

    # --- residual ---
    o_ref[...] = (y + x).astype(o_ref.dtype)


def _pick_row_tile(R: int, D: int, H: int, itemsize: int,
                   max_rows: int, vmem_budget: int) -> int:
    """Largest row tile (multiple of 8, <= max_rows) fitting the VMEM budget."""
    weight_bytes = (D * H + H * D + 2 * D + H + D) * 4  # resident, f32 worst case
    tr = min(max_rows, _round_up(R, 8))
    tr = max(8, (tr // 8) * 8)
    while tr > 8:
        # 2x double-buffered in + 2x out tiles (io dtype) + f32 x/xn/h/y live copies
        per_tile = 4 * tr * D * itemsize + tr * (3 * D + H) * 4
        if weight_bytes + per_tile <= vmem_budget:
            break
        tr -= 8
    return tr


def prenorm_residual(x, gamma, beta, w1, b1, w2, b2,
                     *, eps: float = 1e-5, row_tile: int = 512):
    """Pallas PreNormResidual: fn(LayerNorm(x)) + x with fn = MLP(D->H->D)."""
    orig_shape = x.shape
    D = x.shape[-1]
    H = w1.shape[-1]
    R = math.prod(x.shape[:-1])

    x2 = x.reshape(R, D)

    vmem_limit = 32 * 1024 * 1024
    TR = _pick_row_tile(R, D, H, x.dtype.itemsize, row_tile,
                        vmem_budget=int(vmem_limit * 0.75))
    R_pad = _round_up(R, TR)
    if R_pad != R:
        # Zero rows are harmless through LayerNorm (rsqrt(eps)) and sliced off.
        x2 = jnp.pad(x2, ((0, R_pad - R), (0, 0)))

    gamma2 = gamma.reshape(1, D)
    beta2 = beta.reshape(1, D)
    b1_2 = b1.reshape(1, H)
    b2_2 = b2.reshape(1, D)

    grid = (R_pad // TR,)

    flops_per_row = 2 * D * H * 2 + 10 * D + 8 * H
    cost = pl.CostEstimate(
        flops=flops_per_row * R_pad,
        transcendentals=(H + 1) * R_pad,          # gelu tanh + rsqrt
        bytes_accessed=(2 * R_pad * D) * x.dtype.itemsize
        + (D * H + H * D + 2 * D + H + D) * w1.dtype.itemsize,
    )

    out = pl.pallas_call(
        functools.partial(_prenorm_residual_kernel, eps=eps),
        out_shape=jax.ShapeDtypeStruct((R_pad, D), x.dtype),
        grid_spec=pltpu.PrefetchScalarGridSpec(
            num_scalar_prefetch=0,
            grid=grid,
            in_specs=[
                pl.BlockSpec((TR, D), lambda i: (i, 0)),   # x rows (pipelined)
                pl.BlockSpec((1, D), lambda i: (0, 0)),    # gamma (resident)
                pl.BlockSpec((1, D), lambda i: (0, 0)),    # beta  (resident)
                pl.BlockSpec((D, H), lambda i: (0, 0)),    # w1    (resident)
                pl.BlockSpec((1, H), lambda i: (0, 0)),    # b1    (resident)
                pl.BlockSpec((H, D), lambda i: (0, 0)),    # w2    (resident)
                pl.BlockSpec((1, D), lambda i: (0, 0)),    # b2    (resident)
            ],
            out_specs=pl.BlockSpec((TR, D), lambda i: (i, 0)),
        ),
        compiler_params=pltpu.CompilerParams(
            dimension_semantics=("parallel",),
            vmem_limit_bytes=vmem_limit,
        ),
        cost_estimate=cost,
    )(x2, gamma2, beta2, w1, b1_2, w2, b2_2)

    return out[:R].reshape(orig_shape)


def _reference(x, gamma, beta, w1, b1, w2, b2, eps=1e-5):
    mean = jnp.mean(x, axis=-1, keepdims=True)
    var = jnp.mean((x - mean) ** 2, axis=-1, keepdims=True)
    xn = (x - mean) * lax.rsqrt(var + eps) * gamma + beta
    h = jax.nn.gelu(
        jnp.dot(xn, w1, precision=lax.Precision.HIGHEST) + b1, approximate=True)
    y = jnp.dot(h, w2, precision=lax.Precision.HIGHEST) + b2
    return y + x


if __name__ == "__main__":
    # TODO(synk): `fn` is an arbitrary nn.Module in the PyTorch spec; the
    # canonical MLP-Mixer FeedForward (Linear->GELU->Linear) is used here.
    key = jax.random.PRNGKey(0)
    B, S, D, H = 2, 8, 32, 64  # batch, seq, LayerNorm dim, MLP hidden

    ks = jax.random.split(key, 7)
    x = jax.random.normal(ks[0], (B, S, D), dtype=jnp.float32)
    gamma = jnp.ones((D,), jnp.float32) + 0.1 * jax.random.normal(ks[1], (D,))
    beta = 0.1 * jax.random.normal(ks[2], (D,), dtype=jnp.float32)
    w1 = jax.random.normal(ks[3], (D, H), dtype=jnp.float32) / jnp.sqrt(D)
    b1 = 0.1 * jax.random.normal(ks[4], (H,), dtype=jnp.float32)
    w2 = jax.random.normal(ks[5], (H, D), dtype=jnp.float32) / jnp.sqrt(H)
    b2 = 0.1 * jax.random.normal(ks[6], (D,), dtype=jnp.float32)

    out = prenorm_residual(x, gamma, beta, w1, b1, w2, b2)
    out = jax.block_until_ready(out)

    ref = _reference(x, gamma, beta, w1, b1, w2, b2)
    assert out.shape == x.shape, out.shape
    assert jnp.allclose(out, ref, atol=1e-4, rtol=1e-4), "mismatch vs reference"

    print("KERNEL_OK")
</pallas_src>

<mosaic_0001>
module attributes {stable_mosaic.version = 11 : i64} {
  func.func @_prenorm_residual_kernel(%arg0: i32, %arg1: memref<16x32xf32, #tpu.memory_space<vmem>>, %arg2: memref<1x32xf32, #tpu.memory_space<vmem>>, %arg3: memref<1x32xf32, #tpu.memory_space<vmem>>, %arg4: memref<32x64xf32, #tpu.memory_space<vmem>>, %arg5: memref<1x64xf32, #tpu.memory_space<vmem>>, %arg6: memref<64x32xf32, #tpu.memory_space<vmem>>, %arg7: memref<1x32xf32, #tpu.memory_space<vmem>>, %arg8: memref<16x32xf32, #tpu.memory_space<vmem>>) attributes {dimension_semantics = [#tpu.dimension_semantics<parallel>], iteration_bounds = array<i64: 1>, scalar_prefetch = 0 : i64, scratch_operands = 0 : i64, tpu.core_type = #tpu.core_type<tc>, window_params = [{transform_indices = @transform_0, window_bounds = array<i64: 16, 32>}, {pipeline_mode = #tpu.pipeline_mode<synchronous>, transform_indices = @transform_1, window_bounds = array<i64: 1, 32>}, {pipeline_mode = #tpu.pipeline_mode<synchronous>, transform_indices = @transform_2, window_bounds = array<i64: 1, 32>}, {pipeline_mode = #tpu.pipeline_mode<synchronous>, transform_indices = @transform_3, window_bounds = array<i64: 32, 64>}, {pipeline_mode = #tpu.pipeline_mode<synchronous>, transform_indices = @transform_4, window_bounds = array<i64: 1, 64>}, {pipeline_mode = #tpu.pipeline_mode<synchronous>, transform_indices = @transform_5, window_bounds = array<i64: 64, 32>}, {pipeline_mode = #tpu.pipeline_mode<synchronous>, transform_indices = @transform_6, window_bounds = array<i64: 1, 32>}, {transform_indices = @transform_7, window_bounds = array<i64: 16, 32>}]} {
    %c0 = arith.constant 0 : index
    %c0_0 = arith.constant 0 : index
    %0 = vector.load %arg1[%c0, %c0_0] : memref<16x32xf32, #tpu.memory_space<vmem>>, vector<16x32xf32>
    %cst = arith.constant dense<0.000000e+00> : vector<16xf32>
    %1 = vector.multi_reduction <add>, %0, %cst [1] : vector<16x32xf32> to vector<16xf32>
    %2 = vector.shape_cast %1 : vector<16xf32> to vector<16x1xf32>
    %cst_1 = arith.constant 3.200000e+01 : f32
    %3 = vector.broadcast %cst_1 : f32 to vector<16x1xf32>
    %4 = arith.divf %2, %3 : vector<16x1xf32>
    %5 = vector.broadcast %4 : vector<16x1xf32> to vector<16x32xf32>
    %6 = arith.subf %0, %5 : vector<16x32xf32>
    %7 = arith.mulf %6, %6 : vector<16x32xf32>
    %cst_2 = arith.constant dense<0.000000e+00> : vector<16xf32>
    %8 = vector.multi_reduction <add>, %7, %cst_2 [1] : vector<16x32xf32> to vector<16xf32>
    %9 = vector.shape_cast %8 : vector<16xf32> to vector<16x1xf32>
    %cst_3 = arith.constant 3.200000e+01 : f32
    %10 = vector.broadcast %cst_3 : f32 to vector<16x1xf32>
    %11 = arith.divf %9, %10 : vector<16x1xf32>
    %cst_4 = arith.constant 9.99999974E-6 : f32
    %12 = vector.broadcast %cst_4 : f32 to vector<16x1xf32>
    %13 = arith.addf %11, %12 : vector<16x1xf32>
    %14 = math.rsqrt %13 : vector<16x1xf32>
    %15 = vector.broadcast %14 : vector<16x1xf32> to vector<16x32xf32>
    %16 = arith.mulf %6, %15 : vector<16x32xf32>
    %c0_5 = arith.constant 0 : index
    %c0_6 = arith.constant 0 : index
    %17 = vector.load %arg2[%c0_5, %c0_6] : memref<1x32xf32, #tpu.memory_space<vmem>>, vector<1x32xf32>
    %18 = vector.broadcast %17 : vector<1x32xf32> to vector<16x32xf32>
    %19 = arith.mulf %16, %18 : vector<16x32xf32>
    %c0_7 = arith.constant 0 : index
    %c0_8 = arith.constant 0 : index
    %20 = vector.load %arg3[%c0_7, %c0_8] : memref<1x32xf32, #tpu.memory_space<vmem>>, vector<1x32xf32>
    %21 = vector.broadcast %20 : vector<1x32xf32> to vector<16x32xf32>
    %22 = arith.addf %19, %21 : vector<16x32xf32>
    %c0_9 = arith.constant 0 : index
    %c0_10 = arith.constant 0 : index
    %23 = vector.load %arg4[%c0_9, %c0_10] : memref<32x64xf32, #tpu.memory_space<vmem>>, vector<32x64xf32>
    %cst_11 = arith.constant dense<0.000000e+00> : vector<16x64xf32>
    %24 = tpu.matmul %22, %23, %cst_11 {dimension_numbers = #tpu.dot_dimension_numbers<[1], [0], [0], [1], [0, 0, 1, 1], [], []>, precision = #tpu.contract_precision<fp32>} : vector<16x32xf32>, vector<32x64xf32>, vector<16x64xf32> -> vector<16x64xf32>
    %c0_12 = arith.constant 0 : index
    %c0_13 = arith.constant 0 : index
    %25 = vector.load %arg5[%c0_12, %c0_13] : memref<1x64xf32, #tpu.memory_space<vmem>>, vector<1x64xf32>
    %26 = vector.broadcast %25 : vector<1x64xf32> to vector<16x64xf32>
    %27 = arith.addf %24, %26 : vector<16x64xf32>
    %28 = arith.mulf %27, %27 : vector<16x64xf32>
    %29 = arith.mulf %27, %28 : vector<16x64xf32>
    %cst_14 = arith.constant 4.471500e-02 : f32
    %30 = vector.broadcast %cst_14 : f32 to vector<16x64xf32>
    %31 = arith.mulf %30, %29 : vector<16x64xf32>
    %32 = arith.addf %27, %31 : vector<16x64xf32>
    %cst_15 = arith.constant 0.797884583 : f32
    %33 = vector.broadcast %cst_15 : f32 to vector<16x64xf32>
    %34 = arith.mulf %33, %32 : vector<16x64xf32>
    %35 = math.tanh %34 : vector<16x64xf32>
    %cst_16 = arith.constant 1.000000e+00 : f32
    %36 = vector.broadcast %cst_16 : f32 to vector<16x64xf32>
    %37 = arith.addf %36, %35 : vector<16x64xf32>
    %cst_17 = arith.constant 5.000000e-01 : f32
    %38 = vector.broadcast %cst_17 : f32 to vector<16x64xf32>
    %39 = arith.mulf %38, %37 : vector<16x64xf32>
    %40 = arith.mulf %27, %39 : vector<16x64xf32>
    %c0_18 = arith.constant 0 : index
    %c0_19 = arith.constant 0 : index
    %41 = vector.load %arg6[%c0_18, %c0_19] : memref<64x32xf32, #tpu.memory_space<vmem>>, vector<64x32xf32>
    %cst_20 = arith.constant dense<0.000000e+00> : vector<16x32xf32>
    %42 = tpu.matmul %40, %41, %cst_20 {dimension_numbers = #tpu.dot_dimension_numbers<[1], [0], [0], [1], [0, 0, 1, 1], [], []>, precision = #tpu.contract_precision<fp32>} : vector<16x64xf32>, vector<64x32xf32>, vector<16x32xf32> -> vector<16x32xf32>
    %c0_21 = arith.constant 0 : index
    %c0_22 = arith.constant 0 : index
    %43 = vector.load %arg7[%c0_21, %c0_22] : memref<1x32xf32, #tpu.memory_space<vmem>>, vector<1x32xf32>
    %44 = vector.broadcast %43 : vector<1x32xf32> to vector<16x32xf32>
    %45 = arith.addf %42, %44 : vector<16x32xf32>
    %46 = arith.addf %45, %0 : vector<16x32xf32>
    %c0_23 = arith.constant 0 : index
    %c0_24 = arith.constant 0 : index
    %47 = vector.load %arg8[%c0_23, %c0_24] : memref<16x32xf32, #tpu.memory_space<vmem>>, vector<16x32xf32>
    tpu.vector_store %arg8[%c0_23, %c0_24], %46 {strides = array<i32>} : memref<16x32xf32, #tpu.memory_space<vmem>>, vector<16x32xf32>,
    return
  }
  func.func @transform_0(%arg0: i32) -> (i32, i32) {
    %c0_i32 = arith.constant 0 : i32
    %c0_i32_0 = arith.constant 0 : i32
    return %arg0, %c0_i32 : i32, i32
  }
  func.func @transform_1(%arg0: i32) -> (i32, i32) {
    %c0_i32 = arith.constant 0 : i32
    %c0_i32_0 = arith.constant 0 : i32
    %c0_i32_1 = arith.constant 0 : i32
    return %c0_i32, %c0_i32_0 : i32, i32
  }
  func.func @transform_2(%arg0: i32) -> (i32, i32) {
    %c0_i32 = arith.constant 0 : i32
    %c0_i32_0 = arith.constant 0 : i32
    %c0_i32_1 = arith.constant 0 : i32
    return %c0_i32, %c0_i32_0 : i32, i32
  }
  func.func @transform_3(%arg0: i32) -> (i32, i32) {
    %c0_i32 = arith.constant 0 : i32
    %c0_i32_0 = arith.constant 0 : i32
    %c0_i32_1 = arith.constant 0 : i32
    return %c0_i32, %c0_i32_0 : i32, i32
  }
  func.func @transform_4(%arg0: i32) -> (i32, i32) {
    %c0_i32 = arith.constant 0 : i32
    %c0_i32_0 = arith.constant 0 : i32
    %c0_i32_1 = arith.constant 0 : i32
    return %c0_i32, %c0_i32_0 : i32, i32
  }
  func.func @transform_5(%arg0: i32) -> (i32, i32) {
    %c0_i32 = arith.constant 0 : i32
    %c0_i32_0 = arith.constant 0 : i32
    %c0_i32_1 = arith.constant 0 : i32
    return %c0_i32, %c0_i32_0 : i32, i32
  }
  func.func @transform_6(%arg0: i32) -> (i32, i32) {
    %c0_i32 = arith.constant 0 : i32
    %c0_i32_0 = arith.constant 0 : i32
    %c0_i32_1 = arith.constant 0 : i32
    return %c0_i32, %c0_i32_0 : i32, i32
  }
  func.func @transform_7(%arg0: i32) -> (i32, i32) {
    %c0_i32 = arith.constant 0 : i32
    %c0_i32_0 = arith.constant 0 : i32
    return %arg0, %c0_i32 : i32, i32
  }
}

</mosaic_0001>

<bundles_post_ra>
// kernel: tpu_custom_call.1
= control target key start
LH: loop header
LB: loop body
LE: loop exit
PB: predicated region body
PF: predicated region fallthrough
CT: control target
= control target key end

     0   :  { %vm29_vm0 = vcmask 261120   ;;  %s1962_s0 = inlined_call_operand.vmem [shape: f32[16,32], index: 0, kind: input, shape index: {}]   ;;  %s1963_s1 = inlined_call_operand.vmem [shape: f32[1,32], index: 1, kind: input, shape index: {}]   ;;  %s1964_s2 = inlined_call_operand.vmem [shape: f32[1,32], index: 2, kind: input, shape index: {}]   ;;  %s1965_s3 = inlined_call_operand.vmem [shape: f32[32,64], index: 3, kind: input, shape index: {}]   ;;  %s1966_s4 = inlined_call_operand.vmem [shape: f32[1,64], index: 4, kind: input, shape index: {}]   ;;  %s1967_s5 = inlined_call_operand.vmem [shape: f32[64,32], index: 5, kind: input, shape index: {}]   ;;  %s1968_s6 = inlined_call_operand.vmem [shape: f32[1,32], index: 6, kind: input, shape index: {}]   ;;  %s1969_s7 = inlined_call_operand.hbm [shape: f32[16,32], index: 7, kind: output, shape index: {}]  }
   0x1   :  { %v1789_v0 = vld [vmem:[%s1962_s0] sm:$0xff]  ;;  %v1794_v1 = vld [vmem:[%s1962_s0 + $0x8] sm:$0xff] }
   0x2   :  { %12 = vsyncpa [#allocation3], 0  ;;  %v30_v2 = vsel %vm29_vm0, %v1789_v0, 0.0  ;;  %v33_v3 = vsel %vm29_vm0, %v1794_v1, 0.0  ;;  %v75_v14 = vld [vmem:[%s1965_s3] sm:$0xff]  ;;  %v76_v15 = vld [vmem:[%s1965_s3 + $0x8] sm:$0xff] }
   0x3   :  { %31 = vadd.xlane.f32.xlu0 %v30_v2  ;;  %v77_v16 = vld [vmem:[%s1965_s3 + $0x10] sm:$0xff]  ;;  %v93_v17 = vand.u32 4294901760, %v75_v14  ;;  %v96_v18 = vand.u32 4294901760, %v76_v15  ;;  %v78_v19 = vld [vmem:[%s1965_s3 + $0x18] sm:$0xff]  ;;  %v1260_v53 = vld [vmem:[%s1963_s1] ss:$0 sm:$0xff] }
   0x4   :  { %v99_v20 = vand.u32 4294901760, %v77_v16  ;;  %v102_v21 = vand.u32 4294901760, %v78_v19  ;;  %v1261_v55 = vld [vmem:[%s1964_s2] ss:$0 sm:$0xff]  ;;  %vm653_vm1 = vcmask 523264   ;;  %s1743_s30 = smov [#allocation2]  }
   0x5   :  { %v1816_v22 = vpack.c.bf16 %v96_v18, %v93_v17  ;;  %v183_v24 = vsub.f32 %v75_v14, %v93_v17  ;;  %v190_v25 = vsub.f32 %v76_v15, %v96_v18  ;;  %v640_v18 = vld [vmem:[%s1967_s5 + $0x10] sm:$0xff]  ;;  %s1249_s8 = sshll.u32 %s1743_s30, 4  ;;  %s1250_s8 = int_to_ptr.vmem [resolvable:$true] %s1249_s8 }
   0x6   :  { %v1818_v23 = vpack.c.bf16 %v102_v21, %v99_v20  ;;  %v197_v30 = vsub.f32 %v77_v16, %v99_v20  ;;  %v204_v31 = vsub.f32 %v78_v19, %v102_v21  ;;  %v641_v19 = vld [vmem:[%s1967_s5 + $0x18] sm:$0xff]  ;;  %s1719_s9 = scalar_lea.vmem %s1250_s8, 256  ;;  %p1724_p1 = scmp.lt.s32.totalorder %s1250_s8, %s1250_s8 }
   0x7   :  { %34 = vadd.xlane.f32.xlu0 %v33_v3  ;;  %1541 = vmatprep.subr.bf16.mxu0 %v1816_v22  ;;  %v184_v26 = vand.u32 4294901760, %v183_v24  ;;  %v191_v27 = vand.u32 4294901760, %v190_v25  ;;  %v1556_v42 = vpack.c.bf16 %v190_v25, %v183_v24  ;;  %p1720_p0 = scmp.ne.s32.totalorder %s1250_s8, %s1719_s9  ;;  %p1725_p2 = scmp.lt.s32.totalorder %s1719_s9, %s1719_s9 }
   0x8   :  { %1543 = vmatpush3.bf16.msra.mxu0 %v1816_v22  ;;  %v198_v34 = vand.u32 4294901760, %v197_v30  ;;  %v205_v35 = vand.u32 4294901760, %v204_v31  ;;  %v1560_v43 = vpack.c.bf16 %v204_v31, %v197_v30 }
   0x9   :  { %1545 = vmatprep.subr.bf16.mxu0 %v1818_v23  ;;  %v185_v28 = vsub.f32 %v183_v24, %v184_v26  ;;  %v192_v29 = vsub.f32 %v190_v25, %v191_v27  ;;  %v1572_v44 = vpack.c.bf16 %v191_v27, %v184_v26  ;;  %p1726_p3 = por %p1725_p2, %p1724_p1 }
   0xa   :  { %v199_v37 = vsub.f32 %v197_v30, %v198_v34  ;;  %v206_v38 = vsub.f32 %v204_v31, %v205_v35  ;;  %v1576_v45 = vpack.c.bf16 %v205_v35, %v198_v34 }
   0xb   :  { %v186_v32 = vand.u32 4294901760, %v185_v28  ;;  %v193_v33 = vand.u32 4294901760, %v192_v29  ;;  %v642_v28 = vld [vmem:[%s1967_s5 + $0x20] sm:$0xff]  ;;  %v643_v29 = vld [vmem:[%s1967_s5 + $0x28] sm:$0xff]  ;;  %p1727_p4 = pnand %p1726_p3, %p1720_p0 }
   0xc   :  { %1547 = vmatpush3.bf16.msra.mxu0 %v1818_v23  ;;  %v200_v39 = vand.u32 4294901760, %v199_v37  ;;  %v207_v40 = vand.u32 4294901760, %v206_v38  ;;  %v673_v34 = vand.u32 4294901760, %v642_v28  ;;  %v676_v35 = vand.u32 4294901760, %v643_v29 }
   0xd   :  { %v1548_v36 = vpack.c.bf16 %v193_v33, %v186_v32 }
   0xe   :  { %v1552_v41 = vpack.c.bf16 %v207_v40, %v200_v39  ;;  %v783_v39 = vsub.f32 %v642_v28, %v673_v34  ;;  %v790_v40 = vsub.f32 %v643_v29, %v676_v35 }
   0xf   :  { %1549 = vmatprep.subr.bf16.mxu0 %v1548_v36 }
  0x90   :  { %v32_v4 = vpop.xlane.xlu0 %31 }
  0x91   :  { %v37_v5 = vmul.f32 0.03125, %v32_v4 }
  0x93   :  { %v39_v6 = vsub.f32 %v1789_v0, %v37_v5 }
  0x94   :  { %v35_v7 = vpop.xlane.xlu0 %34 }
  0x95   :  { %v38_v8 = vmul.f32 0.03125, %v35_v7  ;;  %v41_v9 = vmul.f32 %v39_v6, %v39_v6 }
  0x97   :  { %v40_v10 = vsub.f32 %v1794_v1, %v38_v8  ;;  %v43_v11 = vsel %vm29_vm0, %v41_v9, 0.0 }
  0x98   :  { %44 = vadd.xlane.f32.xlu1 %v43_v11 }
  0x99   :  { %v42_v12 = vmul.f32 %v40_v10, %v40_v10 }
  0x9b   :  { %v46_v13 = vsel %vm29_vm0, %v42_v12, 0.0 }
  0x9c   :  { %47 = vadd.xlane.f32.xlu1 %v46_v13  ;;  %v639_v13 = vld [vmem:[%s1967_s5 + $0x8] sm:$0xff] }
  0x9d   :  { %v664_v15 = vand.u32 4294901760, %v639_v13 }
  0x9f   :  { %v1848_v17 = vsub.f32 %v639_v13, %v664_v15 }
  0xa1   :  { %v763_v21 = vand.u32 4294901760, %v1848_v17 }
  0xa3   :  { %v764_v25 = vsub.f32 %v1848_v17, %v763_v21 }
  0xa5   :  { %v765_v31 = vand.u32 4294901760, %v764_v25 }
 0x125   :  { %v45_v46 = vpop.xlane.xlu1 %44 }
 0x126   :  { %v49_v47 = vmul.f32 0.03125, %v45_v46 }
 0x128   :  { %v51_v48 = vadd.f32 1e-05, %v49_v47  ;;  %v784_v47 = vand.u32 4294901760, %v783_v39 }
 0x129   :  { %v48_v49 = vpop.xlane.xlu1 %47 }
 0x12a   :  { %1711 = vrsqrt.f32 %v51_v48  ;;  %v50_v50 = vmul.f32 0.03125, %v48_v49  ;;  %v791_v48 = vand.u32 4294901760, %v790_v40 }
 0x12c   :  { %v52_v51 = vadd.f32 1e-05, %v50_v50 }
 0x12e   :  { %1713 = vrsqrt.f32 %v52_v51 }
 0x134   :  { %v1712_v52 = vpop.eup %1711 }
 0x135   :  { %v55_v54 = vmul.f32 %v1712_v52, %v39_v6  ;;  %v785_v52 = vsub.f32 %v783_v39, %v784_v47 }
 0x137   :  { %v64_v56 = vmul.f32 %v1260_v53, %v55_v54 }
 0x138   :  { %v1714_v57 = vpop.eup %1713 }
 0x139   :  { %v56_v58 = vmul.f32 %v1714_v57, %v40_v10  ;;  %v73_v59 = vadd.f32 %v1261_v55, %v64_v56  ;;  %v638_v10 = vld [vmem:[%s1967_s5] sm:$0xff]  ;;  %v786_v56 = vand.u32 4294901760, %v785_v52 }
 0x13a   :  { %v661_v14 = vand.u32 4294901760, %v638_v10 }
 0x13b   :  { %v65_v60 = vmul.f32 %v1260_v53, %v56_v58  ;;  %v87_v61 = vsel %vm29_vm0, %v73_v59, 0  ;;  %v792_v53 = vsub.f32 %v790_v40, %v791_v48 }
 0x13c   :  { %v161_v62 = vand.u32 4294901760, %v87_v61  ;;  %v1846_v16 = vsub.f32 %v638_v10, %v661_v14  ;;  %v1912_v10 = vpack.c.bf16 %v791_v48, %v784_v47 }
 0x13d   :  { %v74_v63 = vadd.f32 %v1261_v55, %v65_v60  ;;  %v793_v57 = vand.u32 4294901760, %v792_v53  ;;  %v1884_v60 = vpack.c.bf16 %v664_v15, %v661_v14  ;;  %v1262_v14 = vld [vmem:[%s1966_s4] ss:$0 sm:$0xff] }
 0x13e   :  { %v162_v2 = vsub.f32 %v87_v61, %v161_v62  ;;  %v756_v20 = vand.u32 4294901760, %v1846_v16 }
 0x13f   :  { %v90_v3 = vsel %vm29_vm0, %v74_v63, 0  ;;  %v1612_v61 = vpack.c.bf16 %v793_v57, %v786_v56 }
 0x140   :  { %v163_v4 = vand.u32 4294901760, %v162_v2  ;;  %v171_v5 = vand.u32 4294901760, %v90_v3  ;;  %v757_v24 = vsub.f32 %v1846_v16, %v756_v20 }
 0x142   :  { %v164_v7 = vsub.f32 %v162_v2, %v163_v4  ;;  %v172_v6 = vsub.f32 %v90_v3, %v171_v5  ;;  %v758_v30 = vand.u32 4294901760, %v757_v24 }
 0x144   :  { %v165_v8 = vand.u32 4294901760, %v164_v7  ;;  %v173_v9 = vand.u32 4294901760, %v172_v6 }
 0x146   :  { %1368 = vmatprep.mubr.f32.mxu0 %v165_v8  ;;  %v174_v11 = vsub.f32 %v172_v6, %v173_v9  ;;  %v1628_v8 = vpack.c.bf16 %v790_v40, %v783_v39 }
 0x148   :  { %v175_v12 = vand.u32 4294901760, %v174_v11  ;;  %v1908_v11 = vpack.c.bf16 %v763_v21, %v756_v20 }
 0x14a   :  { %1369 = vmatmul.mubr.f32.vlgmr.msra.gmra.mrb[0].mxu0 %v175_v12 }
 0x14b   :  { %1551 = vmatpush3.bf16.msra.mxu0 %v1548_v36  ;;  %1379 = vmatprep.mubr.f32.mxu0 %v161_v62  ;;  %v1604_v36 = vpack.c.bf16 %v765_v31, %v758_v30 }
 0x14c   :  { %1553 = vmatprep.subr.bf16.mxu0 %v1552_v41 }
 0x14d   :  { %1605 = vmatprep.subr.bf16.mxu1 %v1604_v36 }
 0x14e   :  { %1607 = vmatpush3.bf16.msra.mxu1 %v1604_v36 }
 0x14f   :  { %1555 = vmatpush3.bf16.msra.mxu0 %v1552_v41  ;;  %v644_v41 = vld [vmem:[%s1967_s5 + $0x30] sm:$0xff] }
 0x150   :  { %1557 = vmatprep.subr.bf16.mxu0 %v1556_v42 }
 0x152   :  { %1380 = vmatmul.mubr.f32.vlgmr.msra.gmra.mrb[0].mxu0 %v171_v5 }
 0x153   :  { %1559 = vmatpush3.bf16.msra.mxu0 %v1556_v42  ;;  %1390 = vmatprep.mubr.f32.mxu0 %v162_v2  ;;  %v645_v42 = vld [vmem:[%s1967_s5 + $0x38] sm:$0xff] }
 0x154   :  { %1561 = vmatprep.subr.bf16.mxu0 %v1560_v43  ;;  %v682_v46 = vand.u32 4294901760, %v645_v42 }
 0x156   :  { %v804_v51 = vsub.f32 %v645_v42, %v682_v46 }
 0x157   :  { %1563 = vmatpush3.bf16.msra.mxu0 %v1560_v43 }
 0x158   :  { %1565 = vmatprep.subr.bf16.mxu0 %v1816_v22  ;;  %v805_v55 = vand.u32 4294901760, %v804_v51 }
 0x15a   :  { %1391 = vmatmul.mubr.f32.vlgmr.msra.gmra.mrb[0].mxu0 %v172_v6  ;;  %v806_v59 = vsub.f32 %v804_v51, %v805_v55 }
 0x15b   :  { %1567 = vmatpush3.bf16.msra.mxu0 %v1816_v22  ;;  %1401 = vmatprep.mubr.f32.mxu0 %v163_v4  ;;  %v1890_v4 = vpack.c.bf16 %v676_v35, %v673_v34 }
 0x15c   :  { %1569 = vmatprep.subr.bf16.mxu0 %v1818_v23  ;;  %v807_v63 = vand.u32 4294901760, %v806_v59 }
 0x15f   :  { %1571 = vmatpush3.bf16.msra.mxu0 %v1818_v23 }
 0x160   :  { %1573 = vmatprep.subr.bf16.mxu0 %v1572_v44 }
 0x162   :  { %1402 = vmatmul.mubr.f32.vlgmr.msra.gmra.mrb[0].mxu0 %v173_v9 }
 0x163   :  { %1575 = vmatpush3.bf16.msra.mxu0 %v1572_v44  ;;  %1412 = vmatprep.mubr.f32.mxu0 %v161_v62 }
 0x164   :  { %1577 = vmatprep.subr.bf16.mxu0 %v1576_v45 }
 0x167   :  { %1579 = vmatpush3.bf16.msra.mxu0 %v1576_v45  ;;  %v679_v45 = vand.u32 4294901760, %v644_v41 }
 0x168   :  { %1581 = vmatprep.subr.bf16.mxu0 %v1816_v22 }
 0x169   :  { %v797_v50 = vsub.f32 %v644_v41, %v679_v45  ;;  %v1896_v7 = vpack.c.bf16 %v682_v46, %v679_v45 }
 0x16a   :  { %1413 = vmatmul.mubr.f32.vlgmr.msra.gmra.mrb[0].mxu0 %v171_v5 }
 0x16b   :  { %1583 = vmatpush3.bf16.msra.mxu0 %v1816_v22  ;;  %1423 = vmatprep.mubr.f32.mxu0 %v161_v62  ;;  %v667_v22 = vand.u32 4294901760, %v640_v18  ;;  %v798_v54 = vand.u32 4294901760, %v797_v50  ;;  %v1632_v9 = vpack.c.bf16 %v804_v51, %v797_v50  ;;  %v1263_v51 = vld [vmem:[%s1968_s6] ss:$0 sm:$0xff] }
 0x16c   :  { %1585 = vmatprep.subr.bf16.mxu0 %v1818_v23 }
 0x16d   :  { %v1864_v26 = vsub.f32 %v640_v18, %v667_v22  ;;  %v799_v58 = vsub.f32 %v797_v50, %v798_v54  ;;  %v1914_v13 = vpack.c.bf16 %v805_v55, %v798_v54 }
 0x16f   :  { %1587 = vmatpush3.bf16.msra.mxu0 %v1818_v23  ;;  %v670_v23 = vand.u32 4294901760, %v641_v19  ;;  %v770_v32 = vand.u32 4294901760, %v1864_v26  ;;  %v800_v62 = vand.u32 4294901760, %v799_v58 }
 0x170   :  { %1589 = vmatprep.subr.bf16.mxu0 %v1884_v60 }
 0x171   :  { %v1866_v27 = vsub.f32 %v641_v19, %v670_v23  ;;  %v771_v37 = vsub.f32 %v1864_v26, %v770_v32  ;;  %v1616_v2 = vpack.c.bf16 %v807_v63, %v800_v62  ;;  %v1888_v3 = vpack.c.bf16 %v670_v23, %v667_v22 }
 0x172   :  { %1424 = vmatmul.mubr.f32.vlgmr.msra.gmra.mrb[0].mxu0 %v171_v5  ;;  %v1620_v5 = vpack.c.bf16 %v1848_v17, %v1846_v16 }
 0x173   :  { %v777_v33 = vand.u32 4294901760, %v1866_v27  ;;  %v772_v43 = vand.u32 4294901760, %v771_v37  ;;  %1591 = vmatpush3.bf16.msra.mxu0 %v1884_v60  ;;  %v1624_v6 = vpack.c.bf16 %v1866_v27, %v1864_v26 }
 0x174   :  { %1593 = vmatprep.subr.bf16.mxu0 %v1888_v3 }
 0x175   :  { %v778_v38 = vsub.f32 %v1866_v27, %v777_v33  ;;  %v1910_v12 = vpack.c.bf16 %v777_v33, %v770_v32 }
 0x177   :  { %v779_v44 = vand.u32 4294901760, %v778_v38  ;;  %1595 = vmatpush3.bf16.msra.mxu0 %v1888_v3 }
 0x178   :  { %1597 = vmatprep.subr.bf16.mxu0 %v1890_v4 }
 0x179   :  { %v1608_v49 = vpack.c.bf16 %v779_v44, %v772_v43 }
 0x17b   :  { %1609 = vmatprep.subr.bf16.mxu1 %v1608_v49  ;;  %1599 = vmatpush3.bf16.msra.mxu0 %v1890_v4 }
 0x17c   :  { %1611 = vmatpush3.bf16.msra.mxu1 %v1608_v49  ;;  %1601 = vmatprep.subr.bf16.mxu0 %v1896_v7 }
 0x17d   :  { %1613 = vmatprep.subr.bf16.mxu1 %v1612_v61 }
 0x17f   :  { %1603 = vmatpush3.bf16.msra.mxu0 %v1896_v7 }
 0x180   :  { %1615 = vmatpush3.bf16.msra.mxu1 %v1612_v61 }
 0x181   :  { %1617 = vmatprep.subr.bf16.mxu1 %v1616_v2 }
 0x184   :  { %1619 = vmatpush3.bf16.msra.mxu1 %v1616_v2 }
 0x185   :  { %1621 = vmatprep.subr.bf16.mxu1 %v1620_v5 }
 0x245   :  { %v1425_v15 = vpop.f32.mrb[0].mxu0 }
 0x246   :  { %v1684_v18 = vadd.f32 %v1425_v15, %v1262_v14  ;;  %v610_v19 = vpop.f32.mrb[1].mxu0 }
 0x247   :  { %v1685_v22 = vadd.f32 %v1262_v14, %v610_v19 }
 0x248   :  { %v621_v23 = vmul.f32 %v1684_v18, %v1684_v18 }
 0x249   :  { %v620_v16 = vmul.f32 %v1685_v22, %v1685_v22 }
 0x24a   :  { %v623_v24 = vmul.f32 %v1684_v18, %v621_v23 }
 0x24b   :  { %v622_v17 = vmul.f32 %v1685_v22, %v620_v16 }
 0x24c   :  { %v625_v20 = vmul.f32 0.044715, %v623_v24 }
 0x24d   :  { %v624_v21 = vmul.f32 0.044715, %v622_v17 }
 0x24e   :  { %v627_v25 = vadd.f32 %v1684_v18, %v625_v20 }
 0x24f   :  { %v626_v26 = vadd.f32 %v1685_v22, %v624_v21 }
 0x250   :  { %v629_v27 = vmul.f32 0.7978846, %v627_v25 }
 0x251   :  { %v628_v28 = vmul.f32 0.7978846, %v626_v26 }
 0x252   :  { %1715 = vtanh.f32 %v629_v27 }
 0x253   :  { %1717 = vtanh.f32 %v628_v28 }
 0x25c   :  { %v1716_v29 = vpop.eup %1715 }
 0x25d   :  { %v1718_v30 = vpop.eup %1717  ;;  %v633_v31 = vadd.f32 1.0, %v1716_v29 }
 0x25e   :  { %v632_v32 = vadd.f32 1.0, %v1718_v30 }
 0x25f   :  { %v635_v33 = vmul.f32 0.5, %v633_v31 }
 0x260   :  { %v634_v34 = vmul.f32 0.5, %v632_v32 }
 0x261   :  { %v637_v35 = vmul.f32 %v1684_v18, %v635_v33 }
 0x262   :  { %v636_v36 = vmul.f32 %v1685_v22, %v634_v34 }
 0x263   :  { %v658_v37 = vsel %vm653_vm1, %v637_v35, 0 }
 0x264   :  { %v655_v38 = vsel %vm653_vm1, %v636_v36, 0  ;;  %v743_v39 = vand.u32 4294901760, %v658_v37 }
 0x265   :  { %v733_v40 = vand.u32 4294901760, %v655_v38 }
 0x266   :  { %v744_v41 = vsub.f32 %v658_v37, %v743_v39 }
 0x267   :  { %1461 = vmatprep.mubr.f32.mxu1 %v733_v40  ;;  %v734_v42 = vsub.f32 %v655_v38, %v733_v40 }
 0x268   :  { %1462 = vmatmul.mubr.f32.vlgmr.msra.gmra.mrb[0].mxu1 %v743_v39  ;;  %v745_v43 = vand.u32 4294901760, %v744_v41 }
 0x269   :  { %1623 = vmatpush3.bf16.msra.mxu1 %v1620_v5  ;;  %1480 = vmatprep.mubr.f32.mxu1 %v734_v42  ;;  %v735_v44 = vand.u32 4294901760, %v734_v42 }
 0x26a   :  { %1625 = vmatprep.subr.bf16.mxu1 %v1624_v6  ;;  %v746_v45 = vsub.f32 %v744_v41, %v745_v43 }
 0x26b   :  { %v736_v46 = vsub.f32 %v734_v42, %v735_v44 }
 0x26c   :  { %v747_v48 = vand.u32 4294901760, %v746_v45 }
 0x26d   :  { %1627 = vmatpush3.bf16.msra.mxu1 %v1624_v6  ;;  %v737_v47 = vand.u32 4294901760, %v736_v46 }
 0x26e   :  { %1629 = vmatprep.subr.bf16.mxu1 %v1628_v8 }
 0x26f   :  { %1442 = vmatprep.mubr.f32.mxu0 %v737_v47 }
 0x270   :  { %1443 = vmatmul.mubr.f32.vlgmr.msra.gmra.mrb[2].mxu0 %v747_v48 }
 0x271   :  { %1631 = vmatpush3.bf16.msra.mxu1 %v1628_v8 }
 0x272   :  { %1633 = vmatprep.subr.bf16.mxu1 %v1632_v9 }
 0x275   :  { %1635 = vmatpush3.bf16.msra.mxu1 %v1632_v9 }
 0x276   :  { %1637 = vmatprep.subr.bf16.mxu1 %v1884_v60 }
 0x278   :  { %1481 = vmatmul.mubr.f32.vlgmr.msra.gmra.mrb[0].mxu1 %v744_v41 }
 0x279   :  { %1639 = vmatpush3.bf16.msra.mxu1 %v1884_v60  ;;  %1499 = vmatprep.mubr.f32.mxu1 %v735_v44 }
 0x27a   :  { %1641 = vmatprep.subr.bf16.mxu1 %v1888_v3 }
 0x27d   :  { %1643 = vmatpush3.bf16.msra.mxu1 %v1888_v3 }
 0x27e   :  { %1645 = vmatprep.subr.bf16.mxu1 %v1890_v4 }
 0x281   :  { %1647 = vmatpush3.bf16.msra.mxu1 %v1890_v4 }
 0x282   :  { %1649 = vmatprep.subr.bf16.mxu1 %v1896_v7 }
 0x285   :  { %1651 = vmatpush3.bf16.msra.mxu1 %v1896_v7 }
 0x286   :  { %1653 = vmatprep.subr.bf16.mxu1 %v1908_v11 }
 0x288   :  { %1500 = vmatmul.mubr.f32.vlgmr.msra.gmra.mrb[0].mxu1 %v745_v43 }
 0x289   :  { %1655 = vmatpush3.bf16.msra.mxu1 %v1908_v11  ;;  %1518 = vmatprep.mubr.f32.mxu1 %v733_v40 }
 0x28a   :  { %1657 = vmatprep.subr.bf16.mxu1 %v1910_v12 }
 0x28d   :  { %1659 = vmatpush3.bf16.msra.mxu1 %v1910_v12 }
 0x28e   :  { %1661 = vmatprep.subr.bf16.mxu1 %v1912_v10 }
 0x291   :  { %1663 = vmatpush3.bf16.msra.mxu1 %v1912_v10 }
 0x292   :  { %1665 = vmatprep.subr.bf16.mxu1 %v1914_v13 }
 0x295   :  { %1667 = vmatpush3.bf16.msra.mxu1 %v1914_v13 }
 0x296   :  { %1669 = vmatprep.subr.bf16.mxu1 %v1884_v60 }
 0x298   :  { %1519 = vmatmul.mubr.f32.vlgmr.msra.gmra.mrb[0].mxu1 %v743_v39 }
 0x299   :  { %1671 = vmatpush3.bf16.msra.mxu1 %v1884_v60  ;;  %1537 = vmatprep.mubr.f32.mxu1 %v733_v40 }
 0x29a   :  { %1673 = vmatprep.subr.bf16.mxu1 %v1888_v3 }
 0x29d   :  { %1675 = vmatpush3.bf16.msra.mxu1 %v1888_v3 }
 0x29e   :  { %1677 = vmatprep.subr.bf16.mxu1 %v1890_v4 }
 0x2a1   :  { %1679 = vmatpush3.bf16.msra.mxu1 %v1890_v4 }
 0x2a2   :  { %1681 = vmatprep.subr.bf16.mxu1 %v1896_v7 }
 0x2a5   :  { %1683 = vmatpush3.bf16.msra.mxu1 %v1896_v7 }
 0x2a8   :  { %1538 = vmatmul.mubr.f32.vlgmr.msra.gmra.mrb[0].mxu1 %v743_v39 }
 0x343   :  { %v1444_v49 = vpop.f32.mrb[2].mxu0 }
 0x344   :  { %v739_v50 = vpop.f32.mrb[3].mxu0  ;;  %v750_v52 = vadd.f32 %v1444_v49, %v1263_v51 }
 0x345   :  { %v740_v53 = vadd.f32 %v1263_v51, %v739_v50 }
 0x37b   :  { %v1539_v54 = vpop.f32.mrb[0].mxu1 }
 0x37c   :  { %v1687_v55 = vadd.f32 %v1539_v54, %v750_v52  ;;  %v1230_v56 = vpop.f32.mrb[1].mxu1 }
 0x37d   :  { %v1689_v57 = vadd.f32 %v1230_v56, %v740_v53 }
 0x37e   :  { %v1241_v58 = vadd.f32 %v1687_v55, %v1794_v1 }
 0x37f   :  { %v1240_v59 = vadd.f32 %v1689_v57, %v1789_v0 }
 0x380   :  { %1243 = vst.msk [vmem:[#allocation2 + $0x8] sm:$0xff] %vm29_vm0, %v1241_v58 }
 0x381   :  { %1242 = vst.msk [vmem:[#allocation2] sm:$0xff] %vm29_vm0, %v1240_v59 }
 0x382   :  { %1730 = shalt.err (!%p1727_p4)
}
 0x383   :  { %s1731_s11 = scalar_lea.hbm %s1969_s7, 256 }
 0x384   :  { %p1732_p5 = scmp.ne.s32.totalorder %s1969_s7, %s1731_s11  ;;  %p1735_p6 = scmp.lt.u32.totalorder %s1731_s11, %s1969_s7 }
 0x386   :  { %p1737_p7 = pnand %p1735_p6, %p1732_p5 }
 0x388   :  { %1740 = shalt.err (!%p1737_p7)
}
 0x389   :  { %s1744_s1 = smov 128   ;;  %s1745_s2 = smov 8  }
 0x38a   :  { %1255 = dma.vmem_to_hbm [thread:$0]  %s1250_s8, 256, %s1969_s7, [#allocation3], %s1744_s1, %s1744_s1, %s1745_s2  }
 0x38b   :  { %1741 = dma.done.wait [#allocation3], 256  }
 0x38c   :  { %1742 = vsyncadd [#allocation3], 4294967040 }
 0x38d   :  { %1259 = vsyncpa [#allocation3], 1 }

</bundles_post_ra>
